<compile_context>
chip_gen: v6e
topology: v6e:2x2x1
jax: 0.10.0
libtpu: 0.0.40
codegen_flags: <defaults>
</compile_context>

<pallas_src>
import jax
import jax.numpy as jnp
from jax.experimental import pallas as pl
from jax.experimental.pallas import tpu as pltpu


# ----------------------------------------------------------------------------
# Parameter packing (wrapper side): one contiguous (R, H+2) f32 buffer,
# each array starting at an 8-row-aligned offset.
# ----------------------------------------------------------------------------
def pack_params(params, hidden):
    H = hidden
    # Fuse attention vectors into the GAT weights: columns [:,0]=a_dst, [:,1]=a_src
    asad1 = jnp.concatenate([params["ad_g1"].T, params["as_g1"].T], axis=1)  # (H,2)
    asad2 = jnp.concatenate([params["ad_g2"].T, params["as_g2"].T], axis=1)
    waug1 = jnp.concatenate([params["w_g1"], params["w_g1"] @ asad1], axis=1)  # (H,H+2)
    waug2 = jnp.concatenate([params["w_g2"], params["w_g2"] @ asad2], axis=1)

    entries = [
        ("w_gcn", params["w_gcn"]), ("b_gcn", params["b_gcn"]),
        ("w_aug1", waug1),          ("b_g1", params["b_g1"]),
        ("w_aug2", waug2),          ("b_g2", params["b_g2"]),
        ("w_fc1", params["w_fc1"]), ("b_fc1", params["b_fc1"]),
        ("w_fc2", params["w_fc2"]), ("b_fc2", params["b_fc2"]),
    ]
    width = H + 2
    blocks, offsets, off = [], {}, 0
    for name, a in entries:
        r, c = a.shape
        rp = -(-r // 8) * 8                       # pad rows to sublane multiple
        blk = jnp.zeros((rp, width), jnp.float32).at[:r, :c].set(
            a.astype(jnp.float32))
        blocks.append(blk)
        offsets[name] = (off, r, c)
        off += rp
    return jnp.concatenate(blocks, axis=0), offsets


# ----------------------------------------------------------------------------
# Pallas kernel (whole forward pass, single invocation, everything in VMEM)
# ----------------------------------------------------------------------------
def make_drug_encoder_kernel(N, H, B, offsets, neg_slope=0.2):
    def get(pbuf, name):
        off, r, c = offsets[name]
        return pbuf[off:off + r, 0:c]             # static slices of loaded value

    def kernel(x_ref, a_gcn_ref, ea_ref, poolb_ref, pbuf_ref, out_ref):
        f32 = jnp.float32
        pbuf = pbuf_ref[...]                      # one ~24 KiB load, then slice

        # ---------------- GCNConv + ReLU ----------------
        x = x_ref[...]                                                  # (N, Din)
        h = jnp.dot(x, get(pbuf, "w_gcn"), preferred_element_type=f32)  # (N, H)
        h = jnp.dot(a_gcn_ref[...], h, preferred_element_type=f32)      # (N, H)
        h = jnp.maximum(h + get(pbuf, "b_gcn"), 0.0)

        # ---------------- GATConv (+ ReLU) ----------------
        def gat(h, w_aug, b, ea):
            # One MXU pass gives hp AND both attention scores (extra 2 lanes
            # ride in the same 128-lane vreg tile for free).
            aug = jnp.dot(h, w_aug, preferred_element_type=f32)         # (N, H+2)
            hp = aug[:, :H]                                             # (N, H)
            a_dst = aug[:, H:H + 1]                                     # (N, 1)
            a_src_row = jnp.transpose(aug[:, H + 1:H + 2])              # (1, N)

            # ea already has the -1e30 non-edge mask folded in (self-loops
            # guarantee each row keeps a finite max, so softmax is identical).
            raw = a_dst + a_src_row + ea                                # (N, N)
            raw = jnp.maximum(raw, neg_slope * raw)                     # LeakyReLU

            m = jnp.max(raw, axis=-1, keepdims=True)
            p = jnp.exp(raw - m)
            denom = jnp.sum(p, axis=-1, keepdims=True)
            # Deferred normalization: scale the (N,H) PV result, not the (N,N) probs.
            out = (jnp.dot(p, hp, preferred_element_type=f32)
                   * pl.reciprocal(denom, approx=True) + b)
            return jnp.maximum(out, 0.0)

        h = gat(h, get(pbuf, "w_aug1"), get(pbuf, "b_g1"), ea_ref[0])
        h = gat(h, get(pbuf, "w_aug2"), get(pbuf, "b_g2"), ea_ref[1])

        # --------- global_max_pool (per graph) as a (B, H) value -------------
        poolb = poolb_ref[...]                                          # (N, B)
        pooled = jnp.concatenate(
            [jnp.max(h + poolb[:, b:b + 1], axis=0, keepdims=True)
             for b in range(B)], axis=0)                                # (B, H)

        # --------- fc_1 / ReLU / (dropout) / fc_2, batched over graphs -------
        z = (jnp.dot(pooled, get(pbuf, "w_fc1"), preferred_element_type=f32)
             + get(pbuf, "b_fc1"))
        z = jnp.maximum(z, 0.0)
        # TODO(synk): nn.Dropout is identity in eval mode; not applied here.
        out_ref[...] = (jnp.dot(z, get(pbuf, "w_fc2"), preferred_element_type=f32)
                        + get(pbuf, "b_fc2"))

    return kernel


# ----------------------------------------------------------------------------
# Wrapper: fold mask + attention vectors, call pallas_call
# ----------------------------------------------------------------------------
def drug_encoder_forward(x, a_gcn, adj_bias, e_alpha1, e_alpha2, pool_bias,
                         params):
    N, _ = x.shape
    B = pool_bias.shape[1]
    H = params["w_gcn"].shape[1]

    pbuf, offsets = pack_params(params, H)
    kernel = make_drug_encoder_kernel(N, H, B, offsets)

    # Softmax mask folded directly into the per-layer edge-attention terms;
    # the two layers are stacked into one input to cut DMA count.
    ea = jnp.stack([e_alpha1 + adj_bias, e_alpha2 + adj_bias], axis=0)

    inputs = [x, a_gcn, ea, pool_bias, pbuf]

    # VMEM limit derived from the actual resident footprint (+ temporaries
    # and headroom), capped at a v7x-safe value.
    resident = sum(int(a.size) * a.dtype.itemsize for a in inputs) + B * H * 4
    temps = 8 * N * N * 4 + 8 * N * (H + 2) * 4
    vmem_limit = min(max(2 * resident + temps + (1 << 20), 2 << 20), 64 << 20)

    vmem = pl.BlockSpec(memory_space=pltpu.MemorySpace.VMEM)
    return pl.pallas_call(
        kernel,
        out_shape=jax.ShapeDtypeStruct((B, H), jnp.float32),
        in_specs=[vmem] * len(inputs),
        out_specs=vmem,
        compiler_params=pltpu.CompilerParams(vmem_limit_bytes=vmem_limit),
        # TODO(synk): for serving many molecules, add a leading grid axis over
        # batches with dimension_semantics=("parallel",) (2 TCs on v7x) and
        # bf16 MXU operands on v6e/v7x; single tiny call here.
    )(*inputs)


# ----------------------------------------------------------------------------
# Wrapper glue: per-layer dense edge-attention term (plain JAX, outside kernel)
#   e_alpha[i, j] = edge_attr_{j->i} . (W_e^T a_e), with self-loop attr = mean
# ----------------------------------------------------------------------------
def edge_alpha_dense(edge_attr, src, dst, w_e, a_e, N):
    v = jnp.sum(w_e * a_e, axis=-1)                          # (E,)
    scores = edge_attr @ v                                   # (num_edges,)
    mean_score = jnp.mean(edge_attr, axis=0) @ v             # fill_value='mean'
    ea = jnp.zeros((N, N), jnp.float32).at[dst, src].set(scores)
    idx = jnp.arange(N)
    ea = ea.at[idx, idx].set(mean_score)
    return ea


# ----------------------------------------------------------------------------
# Pure-JAX reference (original semantics: mask after LeakyReLU, exact softmax)
# ----------------------------------------------------------------------------
def reference_forward(x, a_gcn, adj_bias, e_alpha1, e_alpha2, pool_bias,
                      params):
    neg_slope = 0.2
    h = jnp.maximum(a_gcn @ (x @ params["w_gcn"]) + params["b_gcn"], 0.0)

    def gat(h, w, b, a_s, a_d, e_alpha):
        hp = h @ w
        asrc = jnp.sum(hp * a_s, axis=-1)                    # (N,)
        adst = jnp.sum(hp * a_d, axis=-1)                    # (N,)
        raw = adst[:, None] + asrc[None, :] + e_alpha
        raw = jnp.where(raw > 0, raw, neg_slope * raw) + adj_bias
        alpha = jax.nn.softmax(raw, axis=-1)
        return jnp.maximum(alpha @ hp + b, 0.0)

    h = gat(h, params["w_g1"], params["b_g1"], params["as_g1"],
            params["ad_g1"], e_alpha1)
    h = gat(h, params["w_g2"], params["b_g2"], params["as_g2"],
            params["ad_g2"], e_alpha2)

    B = pool_bias.shape[1]
    pooled = jnp.stack(
        [jnp.max(h + pool_bias[:, b:b + 1], axis=0) for b in range(B)], axis=0)
    z = jnp.maximum(pooled @ params["w_fc1"] + params["b_fc1"], 0.0)
    return z @ params["w_fc2"] + params["b_fc2"]


# ----------------------------------------------------------------------------
# Main
# ----------------------------------------------------------------------------
if __name__ == "__main__":
    # Small shapes consistent with the module: a batch of 2 molecular graphs.
    IN_DIM, EDGE_DIM, HIDDEN = 8, 4, 32
    N_GRAPH0, N_GRAPH1 = 7, 9
    N = N_GRAPH0 + N_GRAPH1          # 16 nodes total (multiple of 8 sublanes)
    B = 2                            # 2 graphs

    # --- deterministic graph connectivity (bidirectional rings per graph) ---
    src_list, dst_list = [], []

    def add_ring(nodes):
        n = len(nodes)
        for i in range(n):
            a, c = nodes[i], nodes[(i + 1) % n]
            src_list.extend([a, c])
            dst_list.extend([c, a])

    add_ring(list(range(0, N_GRAPH0)))
    add_ring(list(range(N_GRAPH0, N)))
    num_edges = len(src_list)

    key = jax.random.PRNGKey(0)
    keys = jax.random.split(key, 20)

    def nrm(k, shape, scale=0.1):
        return scale * jax.random.normal(k, shape, dtype=jnp.float32)

    x = nrm(keys[0], (N, IN_DIM), scale=1.0)
    edge_attr = nrm(keys[1], (num_edges, EDGE_DIM), scale=1.0)
    src = jnp.array(src_list, dtype=jnp.int32)
    dst = jnp.array(dst_list, dtype=jnp.int32)
    batch = jnp.array([0] * N_GRAPH0 + [1] * N_GRAPH1, dtype=jnp.int32)

    # --- densify the graph (glue, plain JAX) ---
    eye = jnp.eye(N, dtype=jnp.float32)
    A = jnp.zeros((N, N), jnp.float32).at[dst, src].add(1.0)   # rows=dst, cols=src
    A_hat = A + eye
    deg = jnp.sum(A_hat, axis=1)
    dinv = 1.0 / jnp.sqrt(deg)
    a_gcn = dinv[:, None] * A_hat * dinv[None, :]              # normalized GCN adjacency

    mask = ((A + eye) > 0).astype(jnp.float32)                 # GAT edges + self-loops
    adj_bias = jnp.where(mask > 0, 0.0, -1e30).astype(jnp.float32)

    member = (batch[:, None] == jnp.arange(B)[None, :]).astype(jnp.float32)   # (N, B)
    pool_bias = jnp.where(member > 0, 0.0, -1e30).astype(jnp.float32)

    # --- deterministic parameters (math layout: y = x @ W + b) ---
    params = {
        "w_gcn": nrm(keys[2], (IN_DIM, HIDDEN)),
        "b_gcn": nrm(keys[3], (1, HIDDEN)),
        "w_g1": nrm(keys[4], (HIDDEN, HIDDEN)),
        "b_g1": nrm(keys[5], (1, HIDDEN)),
        "as_g1": nrm(keys[6], (1, HIDDEN)),
        "ad_g1": nrm(keys[7], (1, HIDDEN)),
        "we_g1": nrm(keys[8], (EDGE_DIM, HIDDEN)),
        "ae_g1": nrm(keys[9], (1, HIDDEN)),
        "w_g2": nrm(keys[10], (HIDDEN, HIDDEN)),
        "b_g2": nrm(keys[11], (1, HIDDEN)),
        "as_g2": nrm(keys[12], (1, HIDDEN)),
        "ad_g2": nrm(keys[13], (1, HIDDEN)),
        "we_g2": nrm(keys[14], (EDGE_DIM, HIDDEN)),
        "ae_g2": nrm(keys[15], (1, HIDDEN)),
        "w_fc1": nrm(keys[16], (HIDDEN, HIDDEN)),
        "b_fc1": nrm(keys[17], (1, HIDDEN)),
        "w_fc2": nrm(keys[18], (HIDDEN, HIDDEN)),
        "b_fc2": nrm(keys[19], (1, HIDDEN)),
    }

    # --- per-layer edge-attention terms precomputed in the wrapper ---
    e_alpha1 = edge_alpha_dense(edge_attr, src, dst,
                                params["we_g1"], params["ae_g1"], N)
    e_alpha2 = edge_alpha_dense(edge_attr, src, dst,
                                params["we_g2"], params["ae_g2"], N)

    out = drug_encoder_forward(x, a_gcn, adj_bias, e_alpha1, e_alpha2,
                               pool_bias, params)
    out = jax.block_until_ready(out)

    ref = reference_forward(x, a_gcn, adj_bias, e_alpha1, e_alpha2,
                            pool_bias, params)
    assert out.shape == (B, HIDDEN)
    assert jnp.all(jnp.isfinite(out))
    assert jnp.allclose(out, ref, rtol=1e-2, atol=1e-2)

    print("KERNEL_OK")
</pallas_src>

<mosaic_0001>
module attributes {stable_mosaic.version = 11 : i64} {
  func.func @kernel(%arg0: memref<16x8xf32, #tpu.memory_space<vmem>>, %arg1: memref<16x16xf32, #tpu.memory_space<vmem>>, %arg2: memref<2x16x16xf32, #tpu.memory_space<vmem>>, %arg3: memref<16x2xf32, #tpu.memory_space<vmem>>, %arg4: memref<176x34xf32, #tpu.memory_space<vmem>>, %arg5: memref<2x32xf32, #tpu.memory_space<vmem>>) attributes {dimension_semantics = [], scalar_prefetch = 0 : i64, scratch_operands = 0 : i64, tpu.core_type = #tpu.core_type<tc>} {
    %c0 = arith.constant 0 : index
    %c0_0 = arith.constant 0 : index
    %0 = vector.load %arg4[%c0, %c0_0] : memref<176x34xf32, #tpu.memory_space<vmem>>, vector<176x34xf32>
    %c0_1 = arith.constant 0 : index
    %c0_2 = arith.constant 0 : index
    %1 = vector.load %arg0[%c0_1, %c0_2] : memref<16x8xf32, #tpu.memory_space<vmem>>, vector<16x8xf32>
    %2 = vector.extract_strided_slice %0 {offsets = [0, 0], sizes = [8, 32], strides = [1, 1]} : vector<176x34xf32> to vector<8x32xf32>
    %cst = arith.constant dense<0.000000e+00> : vector<16x32xf32>
    %3 = tpu.matmul %1, %2, %cst {dimension_numbers = #tpu.dot_dimension_numbers<[1], [0], [0], [1], [0, 0, 1, 1], [], []>} : vector<16x8xf32>, vector<8x32xf32>, vector<16x32xf32> -> vector<16x32xf32>
    %c0_3 = arith.constant 0 : index
    %c0_4 = arith.constant 0 : index
    %4 = vector.load %arg1[%c0_3, %c0_4] : memref<16x16xf32, #tpu.memory_space<vmem>>, vector<16x16xf32>
    %cst_5 = arith.constant dense<0.000000e+00> : vector<16x32xf32>
    %5 = tpu.matmul %4, %3, %cst_5 {dimension_numbers = #tpu.dot_dimension_numbers<[1], [0], [0], [1], [0, 0, 1, 1], [], []>} : vector<16x16xf32>, vector<16x32xf32>, vector<16x32xf32> -> vector<16x32xf32>
    %6 = vector.extract_strided_slice %0 {offsets = [8, 0], sizes = [1, 32], strides = [1, 1]} : vector<176x34xf32> to vector<1x32xf32>
    %7 = vector.broadcast %6 : vector<1x32xf32> to vector<16x32xf32>
    %8 = arith.addf %5, %7 : vector<16x32xf32>
    %cst_6 = arith.constant 0.000000e+00 : f32
    %9 = vector.broadcast %cst_6 : f32 to vector<16x32xf32>
    %10 = arith.maximumf %8, %9 : vector<16x32xf32>
    %11 = vector.extract_strided_slice %0 {offsets = [16, 0], sizes = [32, 34], strides = [1, 1]} : vector<176x34xf32> to vector<32x34xf32>
    %12 = vector.extract_strided_slice %0 {offsets = [48, 0], sizes = [1, 32], strides = [1, 1]} : vector<176x34xf32> to vector<1x32xf32>
    %c0_7 = arith.constant 0 : index
    %c0_8 = arith.constant 0 : index
    %c0_9 = arith.constant 0 : index
    %13 = vector.load %arg2[%c0_7, %c0_8, %c0_9] : memref<2x16x16xf32, #tpu.memory_space<vmem>>, vector<1x16x16xf32>
    %14 = vector.shape_cast %13 : vector<1x16x16xf32> to vector<16x16xf32>
    %cst_10 = arith.constant dense<0.000000e+00> : vector<16x34xf32>
    %15 = tpu.matmul %10, %11, %cst_10 {dimension_numbers = #tpu.dot_dimension_numbers<[1], [0], [0], [1], [0, 0, 1, 1], [], []>} : vector<16x32xf32>, vector<32x34xf32>, vector<16x34xf32> -> vector<16x34xf32>
    %16 = vector.extract_strided_slice %15 {offsets = [0, 0], sizes = [16, 32], strides = [1, 1]} : vector<16x34xf32> to vector<16x32xf32>
    %17 = vector.extract_strided_slice %15 {offsets = [0, 32], sizes = [16, 1], strides = [1, 1]} : vector<16x34xf32> to vector<16x1xf32>
    %18 = vector.extract_strided_slice %15 {offsets = [0, 33], sizes = [16, 1], strides = [1, 1]} : vector<16x34xf32> to vector<16x1xf32>
    %19 = tpu.transpose %18, [1, 0] : vector<16x1xf32> -> vector<1x16xf32>
    %20 = vector.broadcast %17 : vector<16x1xf32> to vector<16x16xf32>
    %21 = vector.broadcast %19 : vector<1x16xf32> to vector<16x16xf32>
    %22 = arith.addf %20, %21 : vector<16x16xf32>
    %23 = arith.addf %22, %14 : vector<16x16xf32>
    %cst_11 = arith.constant 2.000000e-01 : f32
    %24 = vector.broadcast %cst_11 : f32 to vector<16x16xf32>
    %25 = arith.mulf %24, %23 : vector<16x16xf32>
    %26 = arith.maximumf %23, %25 : vector<16x16xf32>
    %cst_12 = arith.constant dense<0xFF800000> : vector<16xf32>
    %27 = vector.multi_reduction <maximumf>, %26, %cst_12 [1] : vector<16x16xf32> to vector<16xf32>
    %28 = vector.shape_cast %27 : vector<16xf32> to vector<16x1xf32>
    %29 = vector.broadcast %28 : vector<16x1xf32> to vector<16x16xf32>
    %30 = arith.subf %26, %29 : vector<16x16xf32>
    %31 = math.exp %30 : vector<16x16xf32>
    %cst_13 = arith.constant dense<0.000000e+00> : vector<16xf32>
    %32 = vector.multi_reduction <add>, %31, %cst_13 [1] : vector<16x16xf32> to vector<16xf32>
    %33 = vector.shape_cast %32 : vector<16xf32> to vector<16x1xf32>
    %cst_14 = arith.constant dense<0.000000e+00> : vector<16x32xf32>
    %34 = tpu.matmul %31, %16, %cst_14 {dimension_numbers = #tpu.dot_dimension_numbers<[1], [0], [0], [1], [0, 0, 1, 1], [], []>} : vector<16x16xf32>, vector<16x32xf32>, vector<16x32xf32> -> vector<16x32xf32>
    %35 = tpu.reciprocal %33 {approx = true} : vector<16x1xf32> -> vector<16x1xf32>
    %36 = vector.broadcast %35 : vector<16x1xf32> to vector<16x32xf32>
    %37 = arith.mulf %34, %36 : vector<16x32xf32>
    %38 = vector.broadcast %12 : vector<1x32xf32> to vector<16x32xf32>
    %39 = arith.addf %37, %38 : vector<16x32xf32>
    %cst_15 = arith.constant 0.000000e+00 : f32
    %40 = vector.broadcast %cst_15 : f32 to vector<16x32xf32>
    %41 = arith.maximumf %39, %40 : vector<16x32xf32>
    %42 = vector.extract_strided_slice %0 {offsets = [56, 0], sizes = [32, 34], strides = [1, 1]} : vector<176x34xf32> to vector<32x34xf32>
    %43 = vector.extract_strided_slice %0 {offsets = [88, 0], sizes = [1, 32], strides = [1, 1]} : vector<176x34xf32> to vector<1x32xf32>
    %c1 = arith.constant 1 : index
    %c0_16 = arith.constant 0 : index
    %c0_17 = arith.constant 0 : index
    %44 = vector.load %arg2[%c1, %c0_16, %c0_17] : memref<2x16x16xf32, #tpu.memory_space<vmem>>, vector<1x16x16xf32>
    %45 = vector.shape_cast %44 : vector<1x16x16xf32> to vector<16x16xf32>
    %cst_18 = arith.constant dense<0.000000e+00> : vector<16x34xf32>
    %46 = tpu.matmul %41, %42, %cst_18 {dimension_numbers = #tpu.dot_dimension_numbers<[1], [0], [0], [1], [0, 0, 1, 1], [], []>} : vector<16x32xf32>, vector<32x34xf32>, vector<16x34xf32> -> vector<16x34xf32>
    %47 = vector.extract_strided_slice %46 {offsets = [0, 0], sizes = [16, 32], strides = [1, 1]} : vector<16x34xf32> to vector<16x32xf32>
    %48 = vector.extract_strided_slice %46 {offsets = [0, 32], sizes = [16, 1], strides = [1, 1]} : vector<16x34xf32> to vector<16x1xf32>
    %49 = vector.extract_strided_slice %46 {offsets = [0, 33], sizes = [16, 1], strides = [1, 1]} : vector<16x34xf32> to vector<16x1xf32>
    %50 = tpu.transpose %49, [1, 0] : vector<16x1xf32> -> vector<1x16xf32>
    %51 = vector.broadcast %48 : vector<16x1xf32> to vector<16x16xf32>
    %52 = vector.broadcast %50 : vector<1x16xf32> to vector<16x16xf32>
    %53 = arith.addf %51, %52 : vector<16x16xf32>
    %54 = arith.addf %53, %45 : vector<16x16xf32>
    %cst_19 = arith.constant 2.000000e-01 : f32
    %55 = vector.broadcast %cst_19 : f32 to vector<16x16xf32>
    %56 = arith.mulf %55, %54 : vector<16x16xf32>
    %57 = arith.maximumf %54, %56 : vector<16x16xf32>
    %cst_20 = arith.constant dense<0xFF800000> : vector<16xf32>
    %58 = vector.multi_reduction <maximumf>, %57, %cst_20 [1] : vector<16x16xf32> to vector<16xf32>
    %59 = vector.shape_cast %58 : vector<16xf32> to vector<16x1xf32>
    %60 = vector.broadcast %59 : vector<16x1xf32> to vector<16x16xf32>
    %61 = arith.subf %57, %60 : vector<16x16xf32>
    %62 = math.exp %61 : vector<16x16xf32>
    %cst_21 = arith.constant dense<0.000000e+00> : vector<16xf32>
    %63 = vector.multi_reduction <add>, %62, %cst_21 [1] : vector<16x16xf32> to vector<16xf32>
    %64 = vector.shape_cast %63 : vector<16xf32> to vector<16x1xf32>
    %cst_22 = arith.constant dense<0.000000e+00> : vector<16x32xf32>
    %65 = tpu.matmul %62, %47, %cst_22 {dimension_numbers = #tpu.dot_dimension_numbers<[1], [0], [0], [1], [0, 0, 1, 1], [], []>} : vector<16x16xf32>, vector<16x32xf32>, vector<16x32xf32> -> vector<16x32xf32>
    %66 = tpu.reciprocal %64 {approx = true} : vector<16x1xf32> -> vector<16x1xf32>
    %67 = vector.broadcast %66 : vector<16x1xf32> to vector<16x32xf32>
    %68 = arith.mulf %65, %67 : vector<16x32xf32>
    %69 = vector.broadcast %43 : vector<1x32xf32> to vector<16x32xf32>
    %70 = arith.addf %68, %69 : vector<16x32xf32>
    %cst_23 = arith.constant 0.000000e+00 : f32
    %71 = vector.broadcast %cst_23 : f32 to vector<16x32xf32>
    %72 = arith.maximumf %70, %71 : vector<16x32xf32>
    %c0_24 = arith.constant 0 : index
    %c0_25 = arith.constant 0 : index
    %73 = vector.load %arg3[%c0_24, %c0_25] : memref<16x2xf32, #tpu.memory_space<vmem>>, vector<16x2xf32>
    %74 = vector.extract_strided_slice %73 {offsets = [0, 0], sizes = [16, 1], strides = [1, 1]} : vector<16x2xf32> to vector<16x1xf32>
    %75 = vector.broadcast %74 : vector<16x1xf32> to vector<16x32xf32>
    %76 = arith.addf %72, %75 : vector<16x32xf32>
    %cst_26 = arith.constant dense<0xFF800000> : vector<32xf32>
    %77 = vector.multi_reduction <maximumf>, %76, %cst_26 [0] : vector<16x32xf32> to vector<32xf32>
    %78 = vector.shape_cast %77 : vector<32xf32> to vector<1x32xf32>
    %79 = vector.extract_strided_slice %73 {offsets = [0, 1], sizes = [16, 1], strides = [1, 1]} : vector<16x2xf32> to vector<16x1xf32>
    %80 = vector.broadcast %79 : vector<16x1xf32> to vector<16x32xf32>
    %81 = arith.addf %72, %80 : vector<16x32xf32>
    %cst_27 = arith.constant dense<0xFF800000> : vector<32xf32>
    %82 = vector.multi_reduction <maximumf>, %81, %cst_27 [0] : vector<16x32xf32> to vector<32xf32>
    %83 = vector.shape_cast %82 : vector<32xf32> to vector<1x32xf32>
    %84 = tpu.concatenate %78, %83 in 0 : vector<1x32xf32>, vector<1x32xf32> -> vector<2x32xf32>
    %85 = vector.extract_strided_slice %0 {offsets = [96, 0], sizes = [32, 32], strides = [1, 1]} : vector<176x34xf32> to vector<32x32xf32>
    %cst_28 = arith.constant dense<0.000000e+00> : vector<2x32xf32>
    %86 = tpu.matmul %84, %85, %cst_28 {dimension_numbers = #tpu.dot_dimension_numbers<[1], [0], [0], [1], [0, 0, 1, 1], [], []>} : vector<2x32xf32>, vector<32x32xf32>, vector<2x32xf32> -> vector<2x32xf32>
    %87 = vector.extract_strided_slice %0 {offsets = [128, 0], sizes = [1, 32], strides = [1, 1]} : vector<176x34xf32> to vector<1x32xf32>
    %88 = vector.broadcast %87 : vector<1x32xf32> to vector<2x32xf32>
    %89 = arith.addf %86, %88 : vector<2x32xf32>
    %cst_29 = arith.constant 0.000000e+00 : f32
    %90 = vector.broadcast %cst_29 : f32 to vector<2x32xf32>
    %91 = arith.maximumf %89, %90 : vector<2x32xf32>
    %92 = vector.extract_strided_slice %0 {offsets = [136, 0], sizes = [32, 32], strides = [1, 1]} : vector<176x34xf32> to vector<32x32xf32>
    %cst_30 = arith.constant dense<0.000000e+00> : vector<2x32xf32>
    %93 = tpu.matmul %91, %92, %cst_30 {dimension_numbers = #tpu.dot_dimension_numbers<[1], [0], [0], [1], [0, 0, 1, 1], [], []>} : vector<2x32xf32>, vector<32x32xf32>, vector<2x32xf32> -> vector<2x32xf32>
    %94 = vector.extract_strided_slice %0 {offsets = [168, 0], sizes = [1, 32], strides = [1, 1]} : vector<176x34xf32> to vector<1x32xf32>
    %95 = vector.broadcast %94 : vector<1x32xf32> to vector<2x32xf32>
    %96 = arith.addf %93, %95 : vector<2x32xf32>
    %c0_31 = arith.constant 0 : index
    %c0_32 = arith.constant 0 : index
    %97 = vector.load %arg5[%c0_31, %c0_32] : memref<2x32xf32, #tpu.memory_space<vmem>>, vector<2x32xf32>
    tpu.vector_store %arg5[%c0_31, %c0_32], %96 {strides = array<i32>} : memref<2x32xf32, #tpu.memory_space<vmem>>, vector<2x32xf32>,
    return
  }
}

</mosaic_0001>

<bundles_post_ra>
// kernel: tpu_custom_call.1
= control target key start
LH: loop header
LB: loop body
LE: loop exit
PB: predicated region body
PF: predicated region fallthrough
CT: control target
= control target key end

     0   :  { %vm45_vm0 = vcmask 64512   ;;  %s1297_s0 = inlined_call_operand.vmem [shape: f32[16,8], index: 0, kind: input, shape index: {}]   ;;  %s1298_s1 = inlined_call_operand.vmem [shape: f32[16,16], index: 1, kind: input, shape index: {}]   ;;  %s1299_s2 = inlined_call_operand.vmem [shape: f32[2,16,16], index: 2, kind: input, shape index: {}]   ;;  %s1300_s3 = inlined_call_operand.vmem [shape: f32[16,2], index: 3, kind: input, shape index: {}]   ;;  %s1301_s4 = inlined_call_operand.vmem [shape: f32[176,34], index: 4, kind: input, shape index: {}]   ;;  %s1302_s5 = inlined_call_operand.hbm [shape: f32[2,32], index: 5, kind: output, shape index: {}]  }
   0x1   :  { %v21_v0 = vld [vmem:[%s1301_s4] sm:$0xff]  ;;  %v44_v2 = vld [vmem:[%s1297_s0 + $0x8] sm:$0xff] }
   0x2   :  { %v43_v1 = vld [vmem:[%s1297_s0] sm:$0xff]  ;;  %995 = vmatprep.subr.mxu0 %v21_v0 }
   0x3   :  { %997 = vmatprep.mubr.msk.f32.mxu0 %vm45_vm0, %v43_v1 }
   0x4   :  { %10 = vsyncpa [#allocation3], 0  ;;  %996 = vmatpush3.msra.mxu0 %v21_v0  ;;  %v127_v3 = vld [vmem:[%s1298_s1] sm:$0xff]  ;;  %vm133_vm1 = vcmask 130048   ;;  %v128_v6 = vld [vmem:[%s1298_s1 + $0x8] sm:$0xff]  ;;  %v129_v11 = vlaneseq  ;;  %vm219_vm2 = vcmask 261120  }
   0x5   :  { %998 = vmatmul.mubr.msk.f32.vlgmr.msra.gmra.mxu0 %vm45_vm0, %v44_v2  ;;  %1004 = vmatprep.mubr.msk.f32.mxu1 %vm133_vm1, %v127_v3  ;;  %v26_v7 = vld [vmem:[%s1301_s4 + $0x28] sm:$0xff]  ;;  %v25_v8 = vld [vmem:[%s1301_s4 + $0x20] sm:$0xff]  ;;  %v24_v9 = vld [vmem:[%s1301_s4 + $0x18] sm:$0xff]  ;;  %v1114_v22 = vmov 32   ;;  %s1115_s11 = smov 95   ;;  %vm1119_vm3 = vmmov 0  }
   0x6   :  { %1007 = vmatprep.subr.mxu0 %v26_v7  ;;  %v23_v10 = vld [vmem:[%s1301_s4 + $0x10] sm:$0xff]  ;;  %v130_v12 = vshrl.u32 %v129_v11, 7  ;;  %v22_v14 = vld [vmem:[%s1301_s4 + $0x8] sm:$0xff]  ;;  %1072 = vset.pattern.permute.xlu1 %v1114_v22  ;;  %v217_v32 = vld [vmem:[%s1299_s2] sm:$0xff]  ;;  %v1116_v11 = vmov 0   ;;  %vm769_vm4 = vcmask 1040384  }
   0x7   :  { %1008 = vmatpush3.msra.mxu0 %v26_v7  ;;  %v218_v31 = vld [vmem:[%s1299_s2 + $0x8] sm:$0xff]  ;;  %v31_v53 = vld [vmem:[%s1301_s4 + $0x50] sm:$0xff]  ;;  %v29_v55 = vld [vmem:[%s1301_s4 + $0x40] sm:$0xff]  ;;  %s1120_s27 = smov [#allocation2]   ;;  %vm926_vm5 = vcmask 254976  }
   0x8   :  { %1009 = vmatprep.subr.mxu0 %v25_v8  ;;  %v1180_v13 = vsub.s32 0, %v130_v12  ;;  %v30_v54 = vld [vmem:[%s1301_s4 + $0x48] sm:$0xff]  ;;  %v28_v56 = vld [vmem:[%s1301_s4 + $0x38] sm:$0xff]  ;;  %v27_v59 = vld [vmem:[%s1301_s4 + $0x30] sm:$0xff]  ;;  %s934_s0 = sshll.u32 %s1120_s27, 4  ;;  %s935_s0 = int_to_ptr.vmem [resolvable:$true] %s934_s0 }
   0x9   :  { %1010 = vmatpush3.msra.mxu0 %v25_v8  ;;  %s1092_s28 = scalar_lea.vmem %s935_s0, 32  ;;  %p1097_p1 = scmp.lt.s32.totalorder %s935_s0, %s935_s0 }
   0xa   :  { %1011 = vmatprep.subr.mxu0 %v24_v9  ;;  %v132_v15 = vrot.slane %v22_v14, %v1180_v13  ;;  %v467_v62 = vrot.slane %v27_v59, %v1180_v13  ;;  %p1093_p0 = scmp.ne.s32.totalorder %s935_s0, %s1092_s28  ;;  %p1098_p2 = scmp.lt.s32.totalorder %s1092_s28, %s1092_s28 }
   0xb   :  { %1012 = vmatpush3.msra.mxu0 %v24_v9 }
   0xc   :  { %1013 = vmatprep.subr.mxu0 %v23_v10  ;;  %p1099_p3 = por %p1098_p2, %p1097_p1 }
   0xd   :  { %1014 = vmatpush3.msra.mxu0 %v23_v10 }
   0xe   :  { %p1100_p4 = pnand %p1099_p3, %p1093_p0 }
  0xc5   :  { %v999_v4 = vpop.f32.mrf.mxu0 }
  0xc6   :  { %1000 = vmatprep.subr.mxu1 %v999_v4 }
  0xc7   :  { %v118_v5 = vpop.f32.mrf.mxu0  ;;  %1001 = vmatpush3.msra.mxu1 %v999_v4 }
  0xc8   :  { %1002 = vmatprep.subr.mxu1 %v118_v5 }
  0xc9   :  { %1003 = vmatpush3.msra.mxu1 %v118_v5 }
  0xca   :  { %1005 = vmatmul.mubr.msk.f32.vlgmr.msra.gmra.mxu1 %vm133_vm1, %v128_v6 }
 0x18a   :  { %v1006_v16 = vpop.f32.mrf.mxu1 }
 0x18b   :  { %v212_v17 = vadd.f32 %v1006_v16, %v132_v15 }
 0x18c   :  { %v206_v18 = vpop.f32.mrf.mxu1 }
 0x18d   :  { %v207_v19 = vadd.f32 %v206_v18, %v132_v15  ;;  %v216_v21 = vmax.f32 %v212_v17, 0.0  ;;  %v950_v17 = vld [vmem:[%s1299_s2 + $0x10] sm:$0xff]  ;;  %v951_v18 = vld [vmem:[%s1299_s2 + $0x18] sm:$0xff] }
 0x18f   :  { %v215_v20 = vmax.f32 %v207_v19, 0.0 }
 0x191   :  { %1015 = vmatprep.mubr.msk.f32.mxu0 %vm219_vm2, %v215_v20 }
 0x192   :  { %1016 = vmatmul.mubr.msk.f32.vlgmr.msra.gmra.mxu0 %vm219_vm2, %v216_v21 }
 0x252   :  { %v1017_v23 = vpop.f32.mrf.mxu0 }
 0x253   :  { %1018 = vmatprep.subr.mxu1 %v1017_v23 }
 0x254   :  { %v292_v24 = vpop.f32.mrf.mxu0  ;;  %1019 = vmatpush3.msra.mxu1 %v1017_v23 }
 0x255   :  { %342 = vperm.xlu1 %1072, %v292_v24   ;;  %303 = vrot.lane.b32.xlu0 %v292_v24, %s1115_s11 }
 0x256   :  { %1020 = vmatprep.subr.mxu1 %v292_v24 }
 0x257   :  { %1021 = vmatpush3.msra.mxu1 %v292_v24 }
 0x258   :  { %1025 = vmatprep.subr.mxu1 %v31_v53 }
 0x259   :  { %346 = vperm.xlu1 %1072, %v1017_v23   ;;  %305 = vrot.lane.b32.xlu0 %v1017_v23, %s1115_s11 }
 0x2c7   :  { %v304_v25 = vpop.permute.xlu0 %303 }
 0x2c8   :  { %309 = vxpose.xlu0.b32.start [1/2] (short) (narrow) %v304_v25, 8 }
 0x2cb   :  { %v306_v26 = vpop.permute.xlu0 %305 }
 0x2cc   :  { %310 = vxpose.xlu0.b32.end [2/2] (short) (narrow) %v306_v26, 8 }
 0x2d0   :  { %v343_v27 = vpop.permute.xlu1 %342 }
 0x2d4   :  { %v347_v30 = vpop.permute.xlu1 %346 }
 0x2f5   :  { %1073 = vset.pattern.permute.xlu0 %v1116_v11 }
 0x344   :  { %v325_v28 = vpop.trf.xlu0 }
 0x345   :  { %v352_v29 = vrot.slane %v325_v28, %v1180_v13 }
 0x347   :  { %v353_v33 = vadd.f32 %v352_v29, %v343_v27  ;;  %v354_v34 = vadd.f32 %v352_v29, %v347_v30  ;;  %v727_v29 = vld [vmem:[%s1300_s3] sm:$0xff]  ;;  %v1117_v30 = vmov 1  }
 0x349   :  { %v356_v35 = vadd.f32 %v354_v34, %v218_v31  ;;  %v355_v36 = vadd.f32 %v353_v33, %v217_v32  ;;  %v728_v31 = vld [vmem:[%s1300_s3 + $0x8] sm:$0xff] }
 0x34b   :  { %v358_v37 = vmul.f32 0.2, %v356_v35  ;;  %v357_v38 = vmul.f32 0.2, %v355_v36 }
 0x34d   :  { %v360_v39 = vmax.f32 %v356_v35, %v358_v37  ;;  %v359_v40 = vmax.f32 %v355_v36, %v357_v38 }
 0x34f   :  { %v364_v41 = vsel %vm133_vm1, %v360_v39, -inf  ;;  %v361_v42 = vsel %vm133_vm1, %v359_v40, -inf }
 0x350   :  { %365 = vmax.xlane.f32.xlu0 %v364_v41  ;;  %362 = vmax.xlane.f32.xlu1 %v361_v42  ;;  %v1118_v42 = vmov 0.0  }
 0x3d9   :  { %v366_v43 = vpop.xlane.xlu0 %365  ;;  %v363_v44 = vpop.xlane.xlu1 %362 }
 0x3da   :  { %v368_v45 = vsub.f32 %v360_v39, %v366_v43  ;;  %v367_v46 = vsub.f32 %v359_v40, %v363_v44  ;;  %v36_v43 = vld [vmem:[%s1301_s4 + $0x78] sm:$0xff]  ;;  %v35_v44 = vld [vmem:[%s1301_s4 + $0x70] sm:$0xff] }
 0x3dc   :  { %v371_v47 = vmul.f32 1.442695, %v368_v45  ;;  %v369_v48 = vmul.f32 1.442695, %v367_v46  ;;  %v34_v45 = vld [vmem:[%s1301_s4 + $0x68] sm:$0xff]  ;;  %v33_v46 = vld [vmem:[%s1301_s4 + $0x60] sm:$0xff] }
 0x3de   :  { %1076 = vpow2.f32 %v371_v47  ;;  %v41_v47 = vld [vmem:[%s1301_s4 + $0xa0] sm:$0xff] }
 0x3df   :  { %1078 = vpow2.f32 %v369_v48 }
 0x3eb   :  { %v1077_v49 = vpop.eup %1076 }
 0x3ec   :  { %v1079_v50 = vpop.eup %1078  ;;  %v376_v52 = vsel %vm133_vm1, %v1077_v49, 0.0 }
 0x3ed   :  { %1022 = vmatprep.mubr.msk.f32.mxu1 %vm133_vm1, %v1079_v50  ;;  %v373_v51 = vsel %vm133_vm1, %v1079_v50, 0.0 }
 0x3ee   :  { %374 = vadd.xlane.f32.xlu1 %v373_v51  ;;  %1023 = vmatmul.mubr.msk.f32.vlgmr.msra.gmra.mxu1 %vm133_vm1, %v1077_v49 }
 0x3ef   :  { %1026 = vmatpush3.msra.mxu1 %v31_v53 }
 0x3f0   :  { %1027 = vmatprep.subr.mxu1 %v30_v54 }
 0x3f1   :  { %1028 = vmatpush3.msra.mxu1 %v30_v54 }
 0x3f2   :  { %377 = vadd.xlane.f32.xlu1 %v376_v52  ;;  %1029 = vmatprep.subr.mxu1 %v29_v55  ;;  %v32_v52 = vld [vmem:[%s1301_s4 + $0x58] sm:$0xff] }
 0x3f3   :  { %1030 = vmatpush3.msra.mxu1 %v29_v55  ;;  %v722_v53 = vrot.slane %v32_v52, %v1180_v13 }
 0x3f4   :  { %1031 = vmatprep.subr.mxu1 %v28_v56 }
 0x3f5   :  { %1032 = vmatpush3.msra.mxu1 %v28_v56 }
 0x3f6   :  { %1054 = vmatprep.subr.mxu1 %v1118_v42 }
 0x477   :  { %v375_v57 = vpop.xlane.xlu1 %374 }
 0x47b   :  { %v378_v58 = vpop.xlane.xlu1 %377 }
 0x47c   :  { %1080 = vrcp.f32 %v378_v58 }
 0x47d   :  { %1082 = vrcp.f32 %v375_v57 }
 0x489   :  { %v1081_v60 = vpop.eup %1080 }
 0x48a   :  { %v1083_v0 = vpop.eup %1082 }
 0x4ae   :  { %v1024_v61 = vpop.f32.mrf.mxu1 }
 0x4af   :  { %v463_v63 = vmul.f32 %v1081_v60, %v1024_v61 }
 0x4b0   :  { %v451_v1 = vpop.f32.mrf.mxu1 }
 0x4b1   :  { %v462_v2 = vmul.f32 %v1083_v0, %v451_v1  ;;  %v469_v3 = vadd.f32 %v467_v62, %v463_v63 }
 0x4b3   :  { %v468_v4 = vadd.f32 %v467_v62, %v462_v2  ;;  %v471_v6 = vmax.f32 %v469_v3, 0.0 }
 0x4b5   :  { %v470_v5 = vmax.f32 %v468_v4, 0.0 }
 0x4b7   :  { %1033 = vmatprep.mubr.msk.f32.mxu1 %vm219_vm2, %v470_v5 }
 0x4b8   :  { %1034 = vmatmul.mubr.msk.f32.vlgmr.msra.gmra.mxu1 %vm219_vm2, %v471_v6 }
 0x4b9   :  { %1062 = vmatprep.mubr.msk.f32.mxu1 %vm1119_vm3, %v1118_v42  ;;  %1055 = vmatpush3.msra.mxu1 %v41_v47 }
 0x4ba   :  { %1056 = vmatprep.subr.mxu1 %v1118_v42 }
 0x578   :  { %v1035_v7 = vpop.f32.mrf.mxu1 }
 0x579   :  { %1036 = vmatprep.subr.mxu0 %v1035_v7 }
 0x57a   :  { %v547_v8 = vpop.f32.mrf.mxu1  ;;  %1037 = vmatpush3.msra.mxu0 %v1035_v7 }
 0x57b   :  { %558 = vrot.lane.b32.xlu1 %v547_v8, %s1115_s11  ;;  %1038 = vmatprep.subr.mxu0 %v547_v8 }
 0x57c   :  { %1039 = vmatpush3.msra.mxu0 %v547_v8 }
 0x57d   :  { %1043 = vmatprep.subr.mxu0 %v1118_v42 }
 0x57f   :  { %560 = vrot.lane.b32.xlu1 %v1035_v7, %s1115_s11 }
 0x583   :  { %601 = vperm.xlu1 %1072, %v1035_v7  }
 0x587   :  { %597 = vperm.xlu1 %1072, %v547_v8  }
 0x5ed   :  { %v559_v9 = vpop.permute.xlu1 %558 }
 0x5ee   :  { %564 = vxpose.xlu1.b32.start [1/2] (short) (narrow) %v559_v9, 8 }
 0x5f1   :  { %v561_v10 = vpop.permute.xlu1 %560 }
 0x5f2   :  { %565 = vxpose.xlu1.b32.end [2/2] (short) (narrow) %v561_v10, 8 }
 0x5fe   :  { %v602_v12 = vpop.permute.xlu1 %601 }
 0x602   :  { %v598_v14 = vpop.permute.xlu1 %597 }
 0x610   :  { %1074 = vset.pattern.permute.xlu1 %v1116_v11 }
 0x611   :  { %736 = vperm.xlu1 %1074, %v728_v31  }
 0x66a   :  { %v580_v15 = vpop.trf.xlu1 }
 0x66b   :  { %v607_v16 = vrot.slane %v580_v15, %v1180_v13 }
 0x66d   :  { %v608_v19 = vadd.f32 %v607_v16, %v598_v14  ;;  %v609_v20 = vadd.f32 %v607_v16, %v602_v12 }
 0x66f   :  { %v610_v21 = vadd.f32 %v950_v17, %v608_v19  ;;  %v611_v22 = vadd.f32 %v951_v18, %v609_v20 }
 0x671   :  { %v612_v23 = vmul.f32 0.2, %v610_v21  ;;  %v613_v24 = vmul.f32 0.2, %v611_v22 }
 0x673   :  { %v614_v25 = vmax.f32 %v610_v21, %v612_v23  ;;  %v615_v27 = vmax.f32 %v611_v22, %v613_v24 }
 0x675   :  { %v616_v26 = vsel %vm133_vm1, %v614_v25, -inf  ;;  %v619_v28 = vsel %vm133_vm1, %v615_v27, -inf }
 0x676   :  { %617 = vmax.xlane.f32.xlu0 %v616_v26  ;;  %v40_v26 = vld [vmem:[%s1301_s4 + $0x98] sm:$0xff] }
 0x677   :  { %1057 = vmatpush3.msra.mxu1 %v40_v26 }
 0x678   :  { %1058 = vmatprep.subr.mxu1 %v1118_v42 }
 0x67a   :  { %620 = vmax.xlane.f32.xlu0 %v619_v28  ;;  %v38_v28 = vld [vmem:[%s1301_s4 + $0x88] sm:$0xff] }
 0x68c   :  { %v737_v61 = vpop.permute.xlu1 %736 }
 0x690   :  { %731 = vperm.xlu0 %1073, %v727_v29  }
 0x694   :  { %1075 = vset.pattern.permute.xlu0 %v1117_v30 }
 0x695   :  { %751 = vperm.xlu0 %1075, %v727_v29   ;;  %v37_v29 = vld [vmem:[%s1301_s4 + $0x80] sm:$0xff] }
 0x696   :  { %v774_v30 = vrot.slane %v37_v29, %v1180_v13 }
 0x6ff   :  { %v618_v32 = vpop.xlane.xlu0 %617 }
 0x700   :  { %v622_v33 = vsub.f32 %v614_v25, %v618_v32 }
 0x702   :  { %v624_v34 = vmul.f32 1.442695, %v622_v33 }
 0x703   :  { %v621_v35 = vpop.xlane.xlu0 %620 }
 0x704   :  { %1084 = vpow2.f32 %v624_v34  ;;  %v623_v36 = vsub.f32 %v615_v27, %v621_v35  ;;  %v39_v27 = vld [vmem:[%s1301_s4 + $0x90] sm:$0xff]  ;;  %v42_v35 = vld [vmem:[%s1301_s4 + $0xa8] sm:$0xff] }
 0x705   :  { %1059 = vmatpush3.msra.mxu1 %v39_v27 }
 0x706   :  { %v626_v37 = vmul.f32 1.442695, %v623_v36  ;;  %1060 = vmatprep.subr.mxu1 %v1118_v42  ;;  %v852_v36 = vrot.slane %v42_v35, %v1180_v13 }
 0x707   :  { %1061 = vmatpush3.msra.mxu1 %v38_v28 }
 0x708   :  { %1086 = vpow2.f32 %v626_v37 }
 0x70b   :  { %v732_v48 = vpop.permute.xlu0 %731 }
 0x710   :  { %v752_v49 = vpop.permute.xlu0 %751 }
 0x711   :  { %v1085_v38 = vpop.eup %1084 }
 0x712   :  { %1040 = vmatprep.mubr.msk.f32.mxu0 %vm133_vm1, %v1085_v38  ;;  %v628_v39 = vsel %vm133_vm1, %v1085_v38, 0.0 }
 0x713   :  { %629 = vadd.xlane.f32.xlu0 %v628_v39 }
 0x715   :  { %v1087_v40 = vpop.eup %1086 }
 0x716   :  { %1041 = vmatmul.mubr.msk.f32.vlgmr.msra.gmra.mxu0 %vm133_vm1, %v1087_v40  ;;  %v631_v41 = vsel %vm133_vm1, %v1087_v40, 0.0 }
 0x717   :  { %632 = vadd.xlane.f32.xlu0 %v631_v41  ;;  %1044 = vmatpush3.msra.mxu0 %v36_v43 }
 0x718   :  { %1045 = vmatprep.subr.mxu0 %v1118_v42  ;;  %1051 = vmatprep.mubr.msk.f32.mxu0 %vm1119_vm3, %v1118_v42 }
 0x719   :  { %1046 = vmatpush3.msra.mxu0 %v35_v44 }
 0x71a   :  { %1047 = vmatprep.subr.mxu0 %v1118_v42 }
 0x71b   :  { %1048 = vmatpush3.msra.mxu0 %v34_v45 }
 0x71c   :  { %1049 = vmatprep.subr.mxu0 %v1118_v42 }
 0x71d   :  { %1050 = vmatpush3.msra.mxu0 %v33_v46 }
 0x72d   :  { %755 = vperm.xlu0 %1075, %v728_v31  }
 0x79c   :  { %v630_v50 = vpop.xlane.xlu0 %629 }
 0x7a0   :  { %v633_v51 = vpop.xlane.xlu0 %632 }
 0x7a1   :  { %1088 = vrcp.f32 %v633_v51 }
 0x7a2   :  { %1090 = vrcp.f32 %v630_v50 }
 0x7a8   :  { %v756_v0 = vpop.permute.xlu0 %755 }
 0x7ae   :  { %v1089_v54 = vpop.eup %1088 }
 0x7af   :  { %v1091_v57 = vpop.eup %1090 }
 0x7d6   :  { %v1042_v55 = vpop.f32.mrf.mxu0 }
 0x7d7   :  { %v718_v56 = vmul.f32 %v1089_v54, %v1042_v55 }
 0x7d8   :  { %v706_v58 = vpop.f32.mrf.mxu0 }
 0x7d9   :  { %v724_v59 = vadd.f32 %v722_v53, %v718_v56  ;;  %v717_v60 = vmul.f32 %v1091_v57, %v706_v58 }
 0x7db   :  { %v723_v62 = vadd.f32 %v722_v53, %v717_v60  ;;  %v726_v63 = vmax.f32 %v724_v59, 0.0 }
 0x7dd   :  { %v725_v1 = vmax.f32 %v723_v62, 0.0  ;;  %v740_v2 = vadd.f32 %v737_v61, %v726_v63  ;;  %v759_v3 = vadd.f32 %v756_v0, %v726_v63 }
 0x7df   :  { %v739_v4 = vadd.f32 %v732_v48, %v725_v1  ;;  %v758_v5 = vadd.f32 %v752_v49, %v725_v1  ;;  %v742_v8 = vsel %vm219_vm2, %v740_v2, -inf  ;;  %v761_v9 = vsel %vm219_vm2, %v759_v3, -inf }
 0x7e1   :  { %v760_v6 = vsel %vm219_vm2, %v758_v5, -inf  ;;  %v741_v7 = vsel %vm219_vm2, %v739_v4, -inf }
 0x7e2   :  { %v743_v10 = vmax.f32 %v741_v7, %v742_v8  ;;  %v762_v11 = vmax.f32 %v760_v6, %v761_v9 }
 0x7e4   :  { %v744_v12 = vrot.slane %v743_v10, 4  ;;  %v763_v14 = vrot.slane %v762_v11, 4 }
 0x7e6   :  { %v745_v15 = vmax.f32 %v743_v10, %v744_v12  ;;  %v764_v16 = vmax.f32 %v762_v11, %v763_v14 }
 0x7e8   :  { %v746_v17 = vrot.slane %v745_v15, 2  ;;  %v765_v18 = vrot.slane %v764_v16, 2 }
 0x7ea   :  { %v747_v19 = vmax.f32 %v745_v15, %v746_v17  ;;  %v766_v20 = vmax.f32 %v764_v16, %v765_v18 }
 0x7ec   :  { %v748_v21 = vrot.slane %v747_v19, 1  ;;  %v767_v22 = vrot.slane %v766_v20, 1 }
 0x7ee   :  { %v749_v23 = vmax.f32 %v747_v19, %v748_v21  ;;  %v768_v24 = vmax.f32 %v766_v20, %v767_v22 }
 0x7f0   :  { %v770_v25 = vsel %vm769_vm4, %v749_v23, %v768_v24 }
 0x7f1   :  { %1052 = vmatmul.mubr.msk.f32.vlgmr.msra.gmra.mxu0 %vm219_vm2, %v770_v25 }
 0x8b1   :  { %v844_v31 = vpop.f32.mrf.mxu0 }
 0x8b2   :  { %v845_v32 = vadd.f32 %v844_v31, %v774_v30 }
 0x8b3   :  { %v1053_v33 = vpop.f32.mrf.mxu0 }
 0x8b4   :  { %v848_v34 = vmax.f32 %v845_v32, 0.0 }
 0x8b6   :  { %1063 = vmatmul.mubr.msk.f32.vlgmr.msra.gmra.mxu1 %vm219_vm2, %v848_v34 }
 0x976   :  { %v922_v37 = vpop.f32.mrf.mxu1 }
 0x977   :  { %v923_v38 = vadd.f32 %v922_v37, %v852_v36 }
 0x978   :  { %v1064_v39 = vpop.f32.mrf.mxu1 }
 0x979   :  { %927 = vst.msk [vmem:[#allocation2] sm:$0x3] %vm926_vm5, %v923_v38 }
 0x97a   :  { %1103 = shalt.err (!%p1100_p4)
}
 0x97b   :  { %937 = dma.vmem_to_hbm [thread:$0]  %s935_s0, 32, %s1302_s5, [#allocation3]  }
 0x97c   :  { %1112 = dma.done.wait [#allocation3], 32  }
 0x97d   :  { %1113 = vsyncadd [#allocation3], 4294967264 }
 0x97e   :  { %941 = vsyncpa [#allocation3], 1 }

</bundles_post_ra>
